<compile_context>
chip_gen: v7x
topology: tpu7x:2x2x1
jax: 0.10.0
libtpu: 0.0.40
codegen_flags: <defaults>
</compile_context>

<pallas_src>
import jax
import jax.numpy as jnp
from jax.experimental import pallas as pl
from jax.experimental.pallas import tpu as pltpu


NEG_SLOPE = 1.0 / 64.0
_TILE_M_CAP = 2048  # spatial positions per grid step (multiple of 128)


def _focus_conv_kernel(w_ref, x_ref, o_ref):
    # w_ref: (C2, K) bf16, resident   x_ref: (K, TILE_M) bf16   o_ref: (C2, TILE_M) f32
    y = jnp.dot(w_ref[...], x_ref[...], preferred_element_type=jnp.float32)
    # LeakyReLU(1/64) on the f32 accumulator
    o_ref[...] = jnp.where(y >= 0, y, y * NEG_SLOPE).astype(o_ref.dtype)


def focus_forward(x, w, *, compute_dtype=jnp.bfloat16):
    """Focus forward pass.

    x: (B, C1, H, W) float32 NCHW.  w: (C2, 4*C1, 1, 1) conv weight (no bias).
    Returns (B, C2, H//2, W//2) float32 NCHW.
    """
    B, C1, H, W = x.shape
    C2 = w.shape[0]
    K = 4 * C1
    H2, W2 = H // 2, W // 2
    M = H2 * W2

    # --- space-to-depth (exact PyTorch slicing / concat order), kept channel-major
    # so no transpose is needed before or after the kernel ---
    x_cat = jnp.concatenate(
        [x[..., ::2, ::2], x[..., 1::2, ::2], x[..., ::2, 1::2], x[..., 1::2, 1::2]],
        axis=1,
    )  # (B, 4*C1, H2, W2)
    x_flat = x_cat.reshape(B, K, M).astype(compute_dtype)   # free reshape, bf16 cast
    w_mat = w.reshape(C2, K).astype(compute_dtype)          # (C2, K)

    # lane-dense tiling over the big spatial axis (last dim of x / out blocks)
    tile_m = M if M <= _TILE_M_CAP else _TILE_M_CAP
    grid = (B, pl.cdiv(M, tile_m))

    out_flat = pl.pallas_call(
        _focus_conv_kernel,
        out_shape=jax.ShapeDtypeStruct((B, C2, M), jnp.float32),
        grid=grid,
        in_specs=[
            # weight stays resident across the whole grid
            pl.BlockSpec((C2, K), lambda b, m: (0, 0)),
            # activation tile: (K, tile_m), batch dim squeezed
            pl.BlockSpec((None, K, tile_m), lambda b, m: (b, 0, m)),
        ],
        out_specs=pl.BlockSpec((None, C2, tile_m), lambda b, m: (b, 0, m)),
        compiler_params=pltpu.CompilerParams(
            dimension_semantics=("parallel", "parallel"),
        ),
    )(w_mat, x_flat)

    # (B, C2, H2*W2) is already NCHW-flat; reshape is free.
    return out_flat.reshape(B, C2, H2, W2)


def init_focus_weight(key, c1, c2):
    """Deterministic synthetic init for nn.Conv2d(c1*4, c2, 1, bias=False) weight."""
    fan_in = 4 * c1
    bound = 1.0 / jnp.sqrt(jnp.float32(fan_in))
    return jax.random.uniform(
        key, (c2, 4 * c1, 1, 1), dtype=jnp.float32, minval=-bound, maxval=bound
    )


if __name__ == "__main__":
    key = jax.random.PRNGKey(0)
    kx, kw = jax.random.split(key)

    B, C1, H, W = 2, 4, 16, 16
    C2 = 8

    x = jax.random.normal(kx, (B, C1, H, W), dtype=jnp.float32)
    w = init_focus_weight(kw, C1, C2)

    out = focus_forward(x, w)
    out = jax.block_until_ready(out)

    # pure-JAX reference (same bf16 inputs, f32 accumulate) for the same forward pass
    x_cat = jnp.concatenate(
        [x[..., ::2, ::2], x[..., 1::2, ::2], x[..., ::2, 1::2], x[..., 1::2, 1::2]],
        axis=1,
    )
    xc_b = x_cat.astype(jnp.bfloat16)
    w_b = w.reshape(C2, 4 * C1).astype(jnp.bfloat16)
    ref = jnp.einsum("bchw,oc->bohw", xc_b, w_b, preferred_element_type=jnp.float32)
    ref = jnp.where(ref >= 0, ref, ref * NEG_SLOPE)

    assert out.shape == (B, C2, H // 2, W // 2), out.shape
    err = float(jnp.max(jnp.abs(out - ref)))
    assert jnp.allclose(out, ref, atol=1e-3, rtol=1e-3), err

    print("KERNEL_OK")
</pallas_src>

<mosaic_0001>
module attributes {stable_mosaic.version = 11 : i64} {
  func.func @_focus_conv_kernel(%arg0: i32, %arg1: i32, %arg2: memref<8x16xbf16, #tpu.memory_space<vmem>>, %arg3: memref<1x16x64xbf16, #tpu.memory_space<vmem>>, %arg4: memref<1x8x64xf32, #tpu.memory_space<vmem>>) attributes {dimension_semantics = [#tpu.dimension_semantics<parallel>, #tpu.dimension_semantics<parallel>], iteration_bounds = array<i64: 2, 1>, scalar_prefetch = 0 : i64, scratch_operands = 0 : i64, tpu.core_type = #tpu.core_type<tc>, window_params = [{pipeline_mode = #tpu.pipeline_mode<synchronous>, transform_indices = @transform_0, window_bounds = array<i64: 8, 16>}, {transform_indices = @transform_1, window_bounds = array<i64: 1, 16, 64>}, {transform_indices = @transform_2, window_bounds = array<i64: 1, 8, 64>}]} {
    %c0 = arith.constant 0 : index
    %c0_0 = arith.constant 0 : index
    %0 = vector.load %arg2[%c0, %c0_0] : memref<8x16xbf16, #tpu.memory_space<vmem>>, vector<8x16xbf16>
    %c0_1 = arith.constant 0 : index
    %c0_2 = arith.constant 0 : index
    %c0_3 = arith.constant 0 : index
    %1 = vector.load %arg3[%c0_1, %c0_2, %c0_3] : memref<1x16x64xbf16, #tpu.memory_space<vmem>>, vector<1x16x64xbf16>
    %2 = vector.shape_cast %1 : vector<1x16x64xbf16> to vector<16x64xbf16>
    %cst = arith.constant dense<0.000000e+00> : vector<8x64xf32>
    %3 = tpu.matmul %0, %2, %cst {dimension_numbers = #tpu.dot_dimension_numbers<[1], [0], [0], [1], [0, 0, 1, 1], [], []>} : vector<8x16xbf16>, vector<16x64xbf16>, vector<8x64xf32> -> vector<8x64xf32>
    %cst_4 = arith.constant 0.000000e+00 : f32
    %4 = vector.broadcast %cst_4 : f32 to vector<8x64xf32>
    %5 = arith.cmpf oge, %3, %4 : vector<8x64xf32>
    %cst_5 = arith.constant 1.562500e-02 : f32
    %6 = vector.broadcast %cst_5 : f32 to vector<8x64xf32>
    %7 = arith.mulf %3, %6 : vector<8x64xf32>
    %8 = arith.select %5, %3, %7 : vector<8x64xi1>, vector<8x64xf32>
    %c0_6 = arith.constant 0 : index
    %c0_7 = arith.constant 0 : index
    %c0_8 = arith.constant 0 : index
    %9 = vector.load %arg4[%c0_6, %c0_7, %c0_8] : memref<1x8x64xf32, #tpu.memory_space<vmem>>, vector<1x8x64xf32>
    %10 = vector.shape_cast %9 : vector<1x8x64xf32> to vector<8x64xf32>
    %11 = vector.shape_cast %8 : vector<8x64xf32> to vector<1x8x64xf32>
    tpu.vector_store %arg4[%c0_6, %c0_7, %c0_8], %11 {strides = array<i32>} : memref<1x8x64xf32, #tpu.memory_space<vmem>>, vector<1x8x64xf32>,
    return
  }
  func.func @transform_0(%arg0: i32, %arg1: i32) -> (i32, i32) {
    %c0_i32 = arith.constant 0 : i32
    %c0_i32_0 = arith.constant 0 : i32
    %c0_i32_1 = arith.constant 0 : i32
    return %c0_i32, %c0_i32_0 : i32, i32
  }
  func.func @transform_1(%arg0: i32, %arg1: i32) -> (i32, i32, i32) {
    %c0_i32 = arith.constant 0 : i32
    %c0_i32_0 = arith.constant 0 : i32
    return %arg0, %c0_i32, %arg1 : i32, i32, i32
  }
  func.func @transform_2(%arg0: i32, %arg1: i32) -> (i32, i32, i32) {
    %c0_i32 = arith.constant 0 : i32
    %c0_i32_0 = arith.constant 0 : i32
    return %arg0, %c0_i32, %arg1 : i32, i32, i32
  }
}

</mosaic_0001>

<bundles_post_ra>
// kernel: tpu_custom_call.1
= control target key start
LH: loop header
LB: loop body
LE: loop exit
PB: predicated region body
PF: predicated region fallthrough
CT: control target
= control target key end

     0   :  { %7 = vsyncpa [#allocation3], 0  ;;  %s851_s0 = inlined_call_operand.hbm [shape: bf16[8,16], index: 0, kind: input, shape index: {}]   ;;  %s852_s1 = inlined_call_operand.hbm [shape: bf16[2,16,64], index: 1, kind: input, shape index: {}]   ;;  %s853_s2 = inlined_call_operand.hbm [shape: f32[2,8,64], index: 2, kind: output, shape index: {}]  }
   0x1   :  { %8 = vsyncpa [#allocation6], 0 }
   0x2   :  { %10 = vsyncpa [#allocation6 + $0x1], 0 }
   0x3   :  { %11 = vsyncpa [#allocation4], 0 }
   0x4   :  { %13 = vsyncpa [#allocation4 + $0x1], 0  ;;  %s632_s9 = smov 0   ;;  %s634_s10 = smov 0  }
   0x5   :  { %s636_s11 = smov 0   ;;  %s638_s12 = smov 0  }
   0x6   :  { %s640_s13 = smov 0   ;;  %s642_s14 = smov 0  }
   0x7 LB: > { %s359_s15 = sadd.s32 4294967295, %s608_s14   ;;  %s360_s16 = sadd.s32 4294967294, %s608_s14   ;;  %s608_s14 = sphi %s642_s14, %s19_s14   ;;  %s604_s13 = sphi %s640_s13, %s881_s13   ;;  %s600_s12 = sphi %s638_s12, %s880_s12   ;;  %s596_s11 = sphi %s636_s11, %s879_s11   ;;  %s592_s10 = sphi %s634_s10, %s878_s10   ;;  %s588_s9 = sphi %s632_s9, %s877_s9  }
   0x8   : > { %s61_s17 = sadd.s32 1, %s596_s11  ;;  %p68_p0 = scmp.ne.s32.totalorder %s596_s11, %s592_s10 }
   0x9   : > { %p69_p1 = scmp.eq.s32.totalorder %s608_s14, 0  ;;  %p74_p2 = scmp.ne.s32.totalorder %s592_s10, %s588_s9 }
   0xa   : > { %p670_p3 = scmp.eq.s32.totalorder %s359_s15, 0  ;;  %p100_p4 = scmp.eq.s32.totalorder %s359_s15, 1 }
   0xb   : > { %p674_p5 = por %p69_p1, %p68_p0  ;;  %p106_p6 = scmp.eq.s32.totalorder %s360_s16, 1 }
   0xc   : > { %s860_s18 = scalar_select %p670_p3, 1, 0 }
   0xd   : > { %p680_p7 = por %p670_p3, %p74_p2  ;;  %p684_p8 = por %p100_p4, %p68_p0 }
   0xe   : > { %p688_p9 = por %p106_p6, %p74_p2  ;;  %p361_p10 = scmp.ge.s32.totalorder %s608_s14, 1 }
   0xf   : > { %s862_s20 = scalar_select %p680_p7, 1, 0 }
  0x10   : > { %s863_s21 = scalar_select %p684_p8, 1, 0 }
  0x11   : > { %s864_s22 = scalar_select %p688_p9, 1, 0 }
  0x12   : > { %p113_p11 = scmp.lt.s32.totalorder %s608_s14, 3  ;;  %s610_s24 = smov [#allocation2]  }
  0x13   : > { %s126_s25 = sshll.u32 %s610_s24, 4  ;;  %p407_p1 = scmp.lt.s32.totalorder %s608_s14, 2  ;;  %s127_s25 = int_to_ptr.vmem [resolvable:$true] %s126_s25 }
  0x14   : > { %p695_p13 = pnand %p361_p10, %p113_p11  ;;  %s31_s28 = sadd.s32 1, %s604_s13 }
  0x15   : > { %p704_p4 = pnand %p407_p1, %p674_p5  ;;  %p715_p6 = scmp.ge.s32.totalorder %s31_s28, 2 }
  0x16   : > { %s865_s23 = scalar_select %p695_p13, 1, 0 }
  0x17   : > { %p394_p0 = pneg %p695_p13  ;;  %s137_s30 = sand.u32 1, %s596_s11  }
  0x18   : > { %s866_s26 = scalar_select %p704_p4, 1, 0 }
  0x19   : > { %p710_p2 = pnand %p394_p0, %p670_p3  ;;  %s464_s5 = scalar_lea.hbm %s851_s0, 64 }
  0x1a   : > { %s868_s29 = scalar_select %p715_p6, 1, 0 }
  0x1b   : > { %p465_p5 = scmp.ne.s32.totalorder %s851_s0, %s464_s5  ;;  %p466_p10 = pneg %p710_p2 }
  0x1c   : > { %p471_p0 = scmp.lt.u32.totalorder %s464_s5, %s851_s0 }
  0x1d   : > { %p467_p11 = pnand %p466_p10, %p465_p5 }
  0x1f   : > { %p468_p1 = pneg %p467_p11 }
  0x21   : > { %p473_p12 = pnand %p471_p0, %p468_p1 }
  0x23   : > { %476 = shalt.err (!%p473_p12)
}
  0x24   : > { %s477_s16 = scalar_lea.vmem %s127_s25, 64  ;;  %p485_p3 = scmp.lt.s32.totalorder %s127_s25, %s127_s25 }
  0x25   : > { %p478_p9 = scmp.ne.s32.totalorder %s127_s25, %s477_s16  ;;  %p486_p13 = scmp.lt.s32.totalorder %s477_s16, %s477_s16 }
  0x27   : > { %p480_p8 = pnand %p478_p9, %p466_p10  ;;  %p487_p4 = por %p486_p13, %p485_p3 }
  0x29   : > { %p481_p7 = pneg %p480_p8 }
  0x2b   : > { %p488_p6 = pnand %p487_p4, %p481_p7 }
  0x2d   : > { %491 = shalt.err (!%p488_p6)
}
  0x2e   : > { %397 = dma.hbm_to_vmem [thread:$0]  (!%p710_p2), %s851_s0, 64, %s127_s25, [#allocation3]  }
  0x2f   : > { %p869_p9 = scmp.ne.s32.totalorder %s868_s29, 0  ;;  %s364_s3 = sshll.u32 %s137_s30, 3 }
  0x30   : > { %s377_s5 = sshll.u32 %s604_s13, 7  ;;  %s141_s8 = scalar_lea.vmem [#allocation5], %s364_s3 }
  0x31   : > { %s883_s28 = smov (%p869_p9, %s31_s28), 0  ;;  %s746_s7 = scalar_lea.hbm %s852_s1, %s377_s5 }
  0x32   : > { %s56_s4 = ssub.s32 %s604_s13, %s883_s28  ;;  %s149_s15 = sshll.u32 %s141_s8, 4  ;;  %s753_s15 = int_to_ptr.vmem [resolvable:$true] %s149_s15 }
  0x33   : > { %p59_p3 = scmp.eq.s32.totalorder %s56_s4, 0  ;;  %s755_s29 = scalar_lea.sflag [#allocation6], %s137_s30 }
  0x34   : > { %s492_s16 = scalar_lea.hbm %s746_s7, 128  ;;  %p870_p8 = scmp.ne.s32.totalorder %s866_s26, 0 }
  0x35   : > { %s751_s25 = scalar_select %p59_p3, %s596_s11, %s61_s17  }
  0x36   : > { %p493_p7 = scmp.ne.s32.totalorder %s746_s7, %s492_s16  ;;  %p494_p12 = pneg %p870_p8 }
  0x37   : > { %s497_s3 = scalar_lea.hbm %s852_s1, 256  ;;  %p498_p2 = scmp.lt.u32.totalorder %s746_s7, %s852_s1 }
  0x38   : > { %p495_p13 = pnand %p494_p12, %p493_p7  ;;  %p499_p6 = scmp.lt.u32.totalorder %s497_s3, %s492_s16 }
  0x39   : > { %p501_p10 = scmp.lt.u32.totalorder %s492_s16, %s746_s7 }
  0x3a   : > { %p496_p4 = pneg %p495_p13  ;;  %p500_p5 = por %p499_p6, %p498_p2 }
  0x3c   : > { %p502_p11 = por %p501_p10, %p500_p5 }
  0x3e   : > { %p503_p1 = pnand %p502_p11, %p496_p4 }
  0x40   : > { %506 = shalt.err (!%p503_p1)
}
  0x41   : > { %s507_s17 = scalar_lea.vmem %s753_s15, 128  ;;  %s611_s30 = smov [#allocation5]  }
  0x42   : > { %p508_p0 = scmp.ne.s32.totalorder %s753_s15, %s507_s17  ;;  %s512_s27 = sshll.u32 %s611_s30, 4  ;;  %s513_s27 = int_to_ptr.vmem [resolvable:$false] %s512_s27 }
  0x43   : > { %s514_s6 = scalar_lea.vmem %s513_s27, 256  ;;  %p515_p7 = scmp.lt.s32.totalorder %s753_s15, %s513_s27 }
  0x44   : > { %p510_p9 = pnand %p508_p0, %p494_p12  ;;  %p516_p13 = scmp.lt.s32.totalorder %s514_s6, %s507_s17 }
  0x46   : > { %p511_p3 = pneg %p510_p9  ;;  %p517_p2 = por %p516_p13, %p515_p7 }
  0x48   : > { %p518_p6 = pnand %p517_p2, %p511_p3 }
  0x4a   : > { %521 = shalt.err (!%p518_p6)
}
  0x4b   : > { %s612_s8 = smov 64   ;;  %s613_s16 = smov 4  }
  0x4c   : > { %401 = dma.hbm_to_vmem [thread:$0]  (!%p870_p8), %s746_s7, 128, %s753_s15, %s755_s29, %s612_s8, %s612_s8, %s613_s16  }
  0x4d   : > { %p871_p12 = scmp.ne.s32.totalorder %s865_s23, 0 }
  0x4e   : > { %p872_p4 = scmp.ne.s32.totalorder (!%p871_p12), %s860_s18, 0 }
  0x4f   : > { %161 = sbr.rel (%p871_p12) target bundleno = 325 (0x145), region = 28 }
  0x56   : > { %575 = dma.done.wait (%p872_p4), [#allocation3], 64  }
  0x57   : > { %577 = vsyncadd (%p872_p4), [#allocation3], 4294967232  ;;  %s790_s19 = sand.u32 1, %s592_s10   ;;  %p873_p5 = scmp.ne.s32.totalorder %s862_s20, 0 }
  0x58   : > { %s369_s24 = sshll.u32 %s790_s19, 3  ;;  %s168_s3 = scalar_lea.sflag [#allocation6], %s790_s19 }
  0x59   : > { %s171_s4 = scalar_lea.vmem [#allocation5], %s369_s24 }
  0x5a   : > { %579 = dma.done.wait (%p873_p5), %s168_s3, 128  }
  0x5b   : > { %581 = vsyncadd (%p873_p5), %s168_s3, 4294967168  ;;  %v614_v0 = vmov 0.0   ;;  %vm615_vm0 = vmmov 0   ;;  %v463_v1 = vld [vmem:[%s171_s4] sm:$0xff]   ;;  %v193_v2 = vld [vmem:[#allocation2] sm:$0xf] }
  0x5c   : > { %380 = vmatprep.subr.bf16.mxu0 %v614_v0  ;;  %382 = vmatprep.mubr.msk.bf16.mxu0 %vm615_vm0, %v614_v0  ;;  %vm202_vm1 = vcmask 130048   ;;  %s374_s18 = sshll.u32 %s600_s12, 7  ;;  %s191_s23 = scalar_lea.vmem [#allocation7], %s369_s24  ;;  %vm249_vm3 = vcmask 523264  }
  0x5d   : > { %381 = vmatpush3.bf16.msra.mxu0 %v463_v1  ;;  %s266_s26 = sshll.u32 %s191_s23, 4  ;;  %s802_s15 = scalar_lea.hbm %s853_s2, %s374_s18  ;;  %s804_s26 = int_to_ptr.vmem [resolvable:$true] %s266_s26 }
  0x5e   : > { %s252_s12 = scalar_lea.sflag [#allocation4], %s790_s19  ;;  %s522_s29 = scalar_lea.vmem %s804_s26, 128 }
  0x5f   : > { %p523_p8 = scmp.ne.s32.totalorder %s804_s26, %s522_s29  ;;  %p874_p10 = scmp.ne.s32.totalorder %s863_s21, 0 }
  0x60   : > { %383 = vmatmul.mubr.msk.bf16.vlgmr.msra.gmra.mrb[0].mxu0 %vm202_vm1, %v193_v2  ;;  %s616_s5 = smov [#allocation7]  }
  0x61   : > { %p524_p11 = pnand %p523_p8, %p874_p10  ;;  %s526_s17 = sshll.u32 %s616_s5, 4  ;;  %s527_s17 = int_to_ptr.vmem [resolvable:$false] %s526_s17 }
  0x62   : > { %s528_s30 = scalar_lea.vmem %s527_s17, 256  ;;  %p529_p0 = scmp.lt.s32.totalorder %s804_s26, %s527_s17 }
  0x63   : > { %p525_p1 = pneg %p524_p11  ;;  %p530_p9 = scmp.lt.s32.totalorder %s528_s30, %s522_s29 }
  0x65   : > { %p531_p3 = por %p530_p9, %p529_p0 }
  0x67   : > { %p532_p7 = pnand %p531_p3, %p525_p1 }
 0x133   : > { %v240_v3 = vpop.f32.mrb[0].mxu0 }
 0x134   : > { %vm246_vm2 = vcmp.ge.f32.partialorder %v240_v3, 0.0  ;;  %v247_v4 = vmul.f32 0.015625, %v240_v3  ;;  %v384_v5 = vpop.f32.mrb[1].mxu0 }
 0x135   : > { %v243_v6 = vpop.f32.mrb[2].mxu0 }
 0x136   : > { %v248_v7 = vsel %vm246_vm2, %v240_v3, %v247_v4  ;;  %v385_v8 = vpop.f32.mrb[3].mxu0 }
 0x137   : > { %250 = vst.msk [vmem:[%s191_s23] sm:$0xff] %vm249_vm3, %v248_v7 }
 0x138   : > { %535 = shalt.err (!%p532_p7)
}
 0x139   : > { %s536_s27 = scalar_lea.hbm %s802_s15, 128  ;;  %s540_s16 = scalar_lea.hbm %s853_s2, 256 }
 0x13a   : > { %p537_p13 = scmp.ne.s32.totalorder %s802_s15, %s536_s27  ;;  %p541_p12 = scmp.lt.u32.totalorder %s802_s15, %s853_s2 }
 0x13b   : > { %p542_p4 = scmp.lt.u32.totalorder %s540_s16, %s536_s27  ;;  %p544_p8 = scmp.lt.u32.totalorder %s536_s27, %s802_s15 }
 0x13c   : > { %p538_p2 = pnand %p537_p13, %p874_p10 }
 0x13d   : > { %p543_p5 = por %p542_p4, %p541_p12 }
 0x13e   : > { %p539_p6 = pneg %p538_p2 }
 0x13f   : > { %p545_p11 = por %p544_p8, %p543_p5 }
 0x141   : > { %p546_p1 = pnand %p545_p11, %p539_p6 }
 0x143   : > { %549 = shalt.err (!%p546_p1)
}
 0x144   : > { %392 = dma.vmem_to_hbm [thread:$0]  (%p874_p10), %s804_s26, 128, %s802_s15, %s252_s12  }
 0x145 PF: > { %s278_s3 = sand.u32 1, %s588_s9   ;;  %p875_p0 = scmp.ne.s32.totalorder %s864_s22, 0 }
 0x146   : > { %p876_p9 = scmp.ge.s32.totalorder %s608_s14, 2  ;;  %s279_s4 = scalar_lea.sflag [#allocation4], %s278_s3 }
 0x148   : > { %p403_p3 = pnand %p876_p9, %p875_p0 }
 0x14a   : > { %583 = dma.done.wait (!%p403_p3), %s279_s4, 128  }
 0x14b   : > { %585 = vsyncadd (!%p403_p3), %s279_s4, 4294967168  ;;  %s19_s14 = sadd.s32 1, %s608_s14   ;;  %s877_s9 = smov %s592_s10 }
 0x14c   : > { %p16_p7 = scmp.ge.s32.totalorder %s19_s14, 4   ;;  %s878_s10 = smov %s596_s11 }
 0x14d   : > { %s879_s11 = smov %s751_s25  ;;  %s880_s12 = smov %s604_s13 }
 0x14e   : > { %s881_s13 = smov %s883_s28  ;;  %18 = sbr.rel (!%p16_p7) target bundleno = 7 (0x7), region = 78 }
 0x155   :  { %284 = vsyncpa [#allocation3], 1 }
 0x156   :  { %286 = vsyncpa [#allocation3 + $0x1], 1 }
 0x157   :  { %287 = vsyncpa [#allocation6], 1 }
 0x158   :  { %289 = vsyncpa [#allocation6 + $0x1], 1 }
 0x159   :  { %290 = vsyncpa [#allocation4], 1 }
 0x15a   :  { %292 = vsyncpa [#allocation4 + $0x1], 1 }

</bundles_post_ra>
